<compile_context>
chip_gen: v5e
topology: v5e:2x2
jax: 0.10.0
libtpu: 0.0.40
codegen_flags: <defaults>
</compile_context>

<pallas_src>
import functools
import math

import jax
import jax.numpy as jnp
from jax.experimental import pallas as pl
from jax.experimental.pallas import tpu as pltpu


# ----------------------------------------------------------------------------
# Pallas kernel: fused 2-layer Bayesian graph convolution forward.
# One grid step processes `samples_per_step` Monte-Carlo weight samples,
# concatenated along the lane axis.
# ----------------------------------------------------------------------------
def gnn_forward_kernel(a_ref, x_ref, w1_ref, b1_ref, w2_ref, b2_ref, o_ref,
                       *, samples_per_step, hidden):
    a = a_ref[...]                                    # [N, N]       bf16
    x = x_ref[...]                                    # [N, Fin]     bf16

    # Layer 1, re-associated: (A @ X) is sample-independent -> computed once
    # per grid step; then one wide matmul over all samples in the step.
    ax = jnp.dot(a, x, preferred_element_type=jnp.float32)          # [N, Fin] f32

    w1 = w1_ref[...]                                  # [Fin, G*H]   bf16
    h = jnp.dot(ax.astype(jnp.bfloat16), w1,
                preferred_element_type=jnp.float32) + b1_ref[...]   # [N, G*H] f32
    h = jnp.maximum(h, 0.0)
    hb = h.astype(jnp.bfloat16)

    # Layer 2: per-sample H_s @ W2_s on the resident [G, H, O] weight block.
    # G is tiny and static -> fully unrolled at trace time.
    parts = []
    for s in range(samples_per_step):
        h_s = hb[:, s * hidden:(s + 1) * hidden]      # [N, H]
        parts.append(jnp.dot(h_s, w2_ref[s],
                             preferred_element_type=jnp.float32))   # [N, O]
    hw = jnp.concatenate(parts, axis=-1)              # [N, G*O] f32

    # Final aggregation: one wide A @ HW for all samples in the step.
    o = jnp.dot(a, hw.astype(jnp.bfloat16),
                preferred_element_type=jnp.float32) + b2_ref[...]   # [N, G*O] f32
    o_ref[...] = o.astype(o_ref.dtype)


def hetero_bayesian_gnn_forward(adj, x, w1, b1, w2, b2):
    """Fused Bayesian-GNN forward over S MC weight samples in one pallas_call.

    adj: [N, N]      symmetric-normalized adjacency (shared across samples)
    x:   [N, Fin]    node features (shared)
    w1:  [S, Fin, H] sampled layer-1 weights
    b1:  [S, 1, H]
    w2:  [S, H, O]   sampled layer-2 weights
    b2:  [S, 1, O]
    returns [S, N, O] (float32)
    """
    num_samples, fin, hidden = w1.shape
    out_ch = w2.shape[-1]
    n = x.shape[0]

    # Two grid steps (one per TensorCore on v7x; a cheap loop on v5e/v6e);
    # fall back to a single step if S is odd.
    groups = 2 if (num_samples % 2 == 0 and num_samples >= 2) else 1
    spg = num_samples // groups          # samples per grid step

    # Regroup sampled parameters (plain-JAX glue on tiny tensors; no padding):
    #   w1: [S,Fin,H] -> [G, Fin, spg*H]   (samples concatenated along lanes)
    #   w2: [S,H,O]   -> [G, spg, H, O]    (resident per-step weight block)
    w1_g = w1.reshape(groups, spg, fin, hidden).transpose(0, 2, 1, 3) \
             .reshape(groups, fin, spg * hidden)
    b1_g = b1.reshape(groups, spg, 1, hidden).transpose(0, 2, 1, 3) \
             .reshape(groups, 1, spg * hidden)
    w2_g = w2.reshape(groups, spg, hidden, out_ch)
    b2_g = b2.reshape(groups, spg, 1, out_ch).transpose(0, 2, 1, 3) \
             .reshape(groups, 1, spg * out_ch)

    # bf16 MXU inputs; biases / accumulation / activation stay f32.
    bf = jnp.bfloat16
    adj_b, x_b = adj.astype(bf), x.astype(bf)
    w1_b, w2_b = w1_g.astype(bf), w2_g.astype(bf)

    kernel = functools.partial(gnn_forward_kernel,
                               samples_per_step=spg, hidden=hidden)

    out = pl.pallas_call(
        kernel,
        out_shape=jax.ShapeDtypeStruct((groups, n, spg * out_ch), jnp.float32),
        grid=(groups,),
        in_specs=[
            # Shared operands: constant block index -> DMA'd once, re-used.
            pl.BlockSpec((n, n), lambda g: (0, 0)),
            pl.BlockSpec((n, fin), lambda g: (0, 0)),
            # Per-group sampled parameters (leading group dim squeezed).
            pl.BlockSpec((None, fin, spg * hidden), lambda g: (g, 0, 0)),
            pl.BlockSpec((None, 1, spg * hidden), lambda g: (g, 0, 0)),
            pl.BlockSpec((None, spg, hidden, out_ch), lambda g: (g, 0, 0, 0)),
            pl.BlockSpec((None, 1, spg * out_ch), lambda g: (g, 0, 0)),
        ],
        out_specs=pl.BlockSpec((None, n, spg * out_ch), lambda g: (g, 0, 0)),
        compiler_params=pltpu.CompilerParams(
            # Sample-group axis is independent -> split across the 2 TCs on v7x.
            dimension_semantics=("parallel",),
        ),
    )(adj_b, x_b, w1_b, b1_g, w2_b, b2_g)

    # [G, N, spg*O] -> [S, N, O]
    out = out.reshape(groups, n, spg, out_ch).transpose(0, 2, 1, 3)
    return out.reshape(num_samples, n, out_ch)


# ----------------------------------------------------------------------------
# Parameter setup (deterministic, in-script).  Bayesian reparameterization
# W = mu + softplus(rho) * eps, S samples drawn at once (plain-JAX glue).
# ----------------------------------------------------------------------------
def sample_bayesian_weights(key, shape, num_samples):
    k_mu, k_eps = jax.random.split(key)
    fan_in = shape[0]
    bound = 1.0 / math.sqrt(fan_in)
    mu = jax.random.uniform(k_mu, shape, jnp.float32, -bound, bound)
    rho = jnp.full(shape, -5.0, jnp.float32)            # small initial sigma
    sigma = jax.nn.softplus(rho)
    eps = jax.random.normal(k_eps, (num_samples,) + shape, jnp.float32)
    return mu[None] + sigma[None] * eps                  # [S, *shape]


def build_params(key, in_channels, hidden_channels, out_channels, num_samples):
    k1, k2, kb1, kb2 = jax.random.split(key, 4)
    w1 = sample_bayesian_weights(k1, (in_channels, hidden_channels), num_samples)
    w2 = sample_bayesian_weights(k2, (hidden_channels, out_channels), num_samples)
    # Biases are deterministic and shared across MC samples (only W is sampled).
    b1 = jax.random.normal(kb1, (1, hidden_channels), jnp.float32) * 0.01
    b2 = jax.random.normal(kb2, (1, out_channels), jnp.float32) * 0.01
    b1 = jnp.broadcast_to(b1[None], (num_samples, 1, hidden_channels))
    b2 = jnp.broadcast_to(b2[None], (num_samples, 1, out_channels))
    return w1, b1, w2, b2


def build_normalized_adjacency(num_nodes):
    """Ring graph + self loops, symmetric normalization D^-1/2 (A+I) D^-1/2."""
    idx = jnp.arange(num_nodes)
    a = jnp.zeros((num_nodes, num_nodes), jnp.float32)
    a = a.at[idx, (idx + 1) % num_nodes].set(1.0)
    a = a.at[(idx + 1) % num_nodes, idx].set(1.0)
    a = a + jnp.eye(num_nodes, dtype=jnp.float32)        # self loops
    deg = jnp.sum(a, axis=1)
    d_inv_sqrt = 1.0 / jnp.sqrt(deg)
    return a * d_inv_sqrt[:, None] * d_inv_sqrt[None, :]


def reference_forward(adj, x, w1, b1, w2, b2):
    """Pure-JAX reference mirroring the kernel numerics (bf16 MXU inputs,
    f32 accumulation, layer-1 re-association via A@X)."""
    bf = jnp.bfloat16
    a = adj.astype(bf)
    xb = x.astype(bf)

    def one(w1_s, b1_s, w2_s, b2_s):
        ax = jnp.dot(a, xb, preferred_element_type=jnp.float32)
        h = jnp.maximum(
            jnp.dot(ax.astype(bf), w1_s.astype(bf),
                    preferred_element_type=jnp.float32) + b1_s, 0.0)
        hw = jnp.dot(h.astype(bf), w2_s.astype(bf),
                     preferred_element_type=jnp.float32)
        return jnp.dot(a, hw.astype(bf),
                       preferred_element_type=jnp.float32) + b2_s

    return jax.vmap(one)(w1, b1, w2, b2)


if __name__ == "__main__":
    # Small shapes consistent with the module: num_nodes=16, in=4, hidden=32, out=8
    num_nodes = 16
    in_channels = 4
    hidden_channels = 32
    out_channels = 8
    num_samples = 8    # MC weight samples batched through one launch

    key = jax.random.PRNGKey(0)
    k_x, k_params = jax.random.split(key)

    x = jax.random.normal(k_x, (num_nodes, in_channels), jnp.float32)
    adj = build_normalized_adjacency(num_nodes)
    w1, b1, w2, b2 = build_params(
        k_params, in_channels, hidden_channels, out_channels, num_samples
    )

    out = hetero_bayesian_gnn_forward(adj, x, w1, b1, w2, b2)
    out = jax.block_until_ready(out)

    # Pure-JAX reference check of the same forward semerics (same bf16 casts).
    y_ref = reference_forward(adj, x, w1, b1, w2, b2)
    assert out.shape == (num_samples, num_nodes, out_channels)
    assert jnp.allclose(out, y_ref, atol=1e-2, rtol=1e-2)

    print("KERNEL_OK")
</pallas_src>

<mosaic_0001>
module attributes {stable_mosaic.version = 11 : i64} {
  func.func @gnn_forward_kernel(%arg0: i32, %arg1: memref<16x16xbf16, #tpu.memory_space<vmem>>, %arg2: memref<16x4xbf16, #tpu.memory_space<vmem>>, %arg3: memref<1x4x128xbf16, #tpu.memory_space<vmem>>, %arg4: memref<1x1x128xf32, #tpu.memory_space<vmem>>, %arg5: memref<1x4x32x8xbf16, #tpu.memory_space<vmem>>, %arg6: memref<1x1x32xf32, #tpu.memory_space<vmem>>, %arg7: memref<1x16x32xf32, #tpu.memory_space<vmem>>) attributes {dimension_semantics = [#tpu.dimension_semantics<parallel>], iteration_bounds = array<i64: 2>, scalar_prefetch = 0 : i64, scratch_operands = 0 : i64, tpu.core_type = #tpu.core_type<tc>, window_params = [{pipeline_mode = #tpu.pipeline_mode<synchronous>, transform_indices = @transform_0, window_bounds = array<i64: 16, 16>}, {pipeline_mode = #tpu.pipeline_mode<synchronous>, transform_indices = @transform_1, window_bounds = array<i64: 16, 4>}, {transform_indices = @transform_2, window_bounds = array<i64: 1, 4, 128>}, {transform_indices = @transform_3, window_bounds = array<i64: 1, 1, 128>}, {transform_indices = @transform_4, window_bounds = array<i64: 1, 4, 32, 8>}, {transform_indices = @transform_5, window_bounds = array<i64: 1, 1, 32>}, {transform_indices = @transform_6, window_bounds = array<i64: 1, 16, 32>}]} {
    %c0 = arith.constant 0 : index
    %c0_0 = arith.constant 0 : index
    %0 = vector.load %arg1[%c0, %c0_0] : memref<16x16xbf16, #tpu.memory_space<vmem>>, vector<16x16xbf16>
    %c0_1 = arith.constant 0 : index
    %c0_2 = arith.constant 0 : index
    %1 = vector.load %arg2[%c0_1, %c0_2] : memref<16x4xbf16, #tpu.memory_space<vmem>>, vector<16x4xbf16>
    %cst = arith.constant dense<0.000000e+00> : vector<16x4xf32>
    %2 = tpu.matmul %0, %1, %cst {dimension_numbers = #tpu.dot_dimension_numbers<[1], [0], [0], [1], [0, 0, 1, 1], [], []>} : vector<16x16xbf16>, vector<16x4xbf16>, vector<16x4xf32> -> vector<16x4xf32>
    %c0_3 = arith.constant 0 : index
    %c0_4 = arith.constant 0 : index
    %c0_5 = arith.constant 0 : index
    %3 = vector.load %arg3[%c0_3, %c0_4, %c0_5] : memref<1x4x128xbf16, #tpu.memory_space<vmem>>, vector<1x4x128xbf16>
    %4 = vector.shape_cast %3 : vector<1x4x128xbf16> to vector<4x128xbf16>
    %5 = arith.truncf %2 : vector<16x4xf32> to vector<16x4xbf16>
    %cst_6 = arith.constant dense<0.000000e+00> : vector<16x128xf32>
    %6 = tpu.matmul %5, %4, %cst_6 {dimension_numbers = #tpu.dot_dimension_numbers<[1], [0], [0], [1], [0, 0, 1, 1], [], []>} : vector<16x4xbf16>, vector<4x128xbf16>, vector<16x128xf32> -> vector<16x128xf32>
    %c0_7 = arith.constant 0 : index
    %c0_8 = arith.constant 0 : index
    %c0_9 = arith.constant 0 : index
    %7 = vector.load %arg4[%c0_7, %c0_8, %c0_9] : memref<1x1x128xf32, #tpu.memory_space<vmem>>, vector<1x1x128xf32>
    %8 = vector.shape_cast %7 : vector<1x1x128xf32> to vector<1x128xf32>
    %9 = vector.broadcast %8 : vector<1x128xf32> to vector<16x128xf32>
    %10 = arith.addf %6, %9 : vector<16x128xf32>
    %cst_10 = arith.constant 0.000000e+00 : f32
    %11 = vector.broadcast %cst_10 : f32 to vector<16x128xf32>
    %12 = arith.maximumf %10, %11 : vector<16x128xf32>
    %13 = arith.truncf %12 : vector<16x128xf32> to vector<16x128xbf16>
    %14 = vector.extract_strided_slice %13 {offsets = [0, 0], sizes = [16, 32], strides = [1, 1]} : vector<16x128xbf16> to vector<16x32xbf16>
    %c0_11 = arith.constant 0 : index
    %c0_12 = arith.constant 0 : index
    %c0_13 = arith.constant 0 : index
    %c0_14 = arith.constant 0 : index
    %15 = vector.load %arg5[%c0_11, %c0_12, %c0_13, %c0_14] : memref<1x4x32x8xbf16, #tpu.memory_space<vmem>>, vector<1x1x32x8xbf16>
    %16 = vector.shape_cast %15 : vector<1x1x32x8xbf16> to vector<32x8xbf16>
    %cst_15 = arith.constant dense<0.000000e+00> : vector<16x8xf32>
    %17 = tpu.matmul %14, %16, %cst_15 {dimension_numbers = #tpu.dot_dimension_numbers<[1], [0], [0], [1], [0, 0, 1, 1], [], []>} : vector<16x32xbf16>, vector<32x8xbf16>, vector<16x8xf32> -> vector<16x8xf32>
    %18 = vector.extract_strided_slice %13 {offsets = [0, 32], sizes = [16, 32], strides = [1, 1]} : vector<16x128xbf16> to vector<16x32xbf16>
    %c0_16 = arith.constant 0 : index
    %c1 = arith.constant 1 : index
    %c0_17 = arith.constant 0 : index
    %c0_18 = arith.constant 0 : index
    %19 = vector.load %arg5[%c0_16, %c1, %c0_17, %c0_18] : memref<1x4x32x8xbf16, #tpu.memory_space<vmem>>, vector<1x1x32x8xbf16>
    %20 = vector.shape_cast %19 : vector<1x1x32x8xbf16> to vector<32x8xbf16>
    %cst_19 = arith.constant dense<0.000000e+00> : vector<16x8xf32>
    %21 = tpu.matmul %18, %20, %cst_19 {dimension_numbers = #tpu.dot_dimension_numbers<[1], [0], [0], [1], [0, 0, 1, 1], [], []>} : vector<16x32xbf16>, vector<32x8xbf16>, vector<16x8xf32> -> vector<16x8xf32>
    %22 = vector.extract_strided_slice %13 {offsets = [0, 64], sizes = [16, 32], strides = [1, 1]} : vector<16x128xbf16> to vector<16x32xbf16>
    %c0_20 = arith.constant 0 : index
    %c2 = arith.constant 2 : index
    %c0_21 = arith.constant 0 : index
    %c0_22 = arith.constant 0 : index
    %23 = vector.load %arg5[%c0_20, %c2, %c0_21, %c0_22] : memref<1x4x32x8xbf16, #tpu.memory_space<vmem>>, vector<1x1x32x8xbf16>
    %24 = vector.shape_cast %23 : vector<1x1x32x8xbf16> to vector<32x8xbf16>
    %cst_23 = arith.constant dense<0.000000e+00> : vector<16x8xf32>
    %25 = tpu.matmul %22, %24, %cst_23 {dimension_numbers = #tpu.dot_dimension_numbers<[1], [0], [0], [1], [0, 0, 1, 1], [], []>} : vector<16x32xbf16>, vector<32x8xbf16>, vector<16x8xf32> -> vector<16x8xf32>
    %26 = vector.extract_strided_slice %13 {offsets = [0, 96], sizes = [16, 32], strides = [1, 1]} : vector<16x128xbf16> to vector<16x32xbf16>
    %c0_24 = arith.constant 0 : index
    %c3 = arith.constant 3 : index
    %c0_25 = arith.constant 0 : index
    %c0_26 = arith.constant 0 : index
    %27 = vector.load %arg5[%c0_24, %c3, %c0_25, %c0_26] : memref<1x4x32x8xbf16, #tpu.memory_space<vmem>>, vector<1x1x32x8xbf16>
    %28 = vector.shape_cast %27 : vector<1x1x32x8xbf16> to vector<32x8xbf16>
    %cst_27 = arith.constant dense<0.000000e+00> : vector<16x8xf32>
    %29 = tpu.matmul %26, %28, %cst_27 {dimension_numbers = #tpu.dot_dimension_numbers<[1], [0], [0], [1], [0, 0, 1, 1], [], []>} : vector<16x32xbf16>, vector<32x8xbf16>, vector<16x8xf32> -> vector<16x8xf32>
    %30 = tpu.concatenate %17, %21, %25, %29 in 1 : vector<16x8xf32>, vector<16x8xf32>, vector<16x8xf32>, vector<16x8xf32> -> vector<16x32xf32>
    %31 = arith.truncf %30 : vector<16x32xf32> to vector<16x32xbf16>
    %cst_28 = arith.constant dense<0.000000e+00> : vector<16x32xf32>
    %32 = tpu.matmul %0, %31, %cst_28 {dimension_numbers = #tpu.dot_dimension_numbers<[1], [0], [0], [1], [0, 0, 1, 1], [], []>} : vector<16x16xbf16>, vector<16x32xbf16>, vector<16x32xf32> -> vector<16x32xf32>
    %c0_29 = arith.constant 0 : index
    %c0_30 = arith.constant 0 : index
    %c0_31 = arith.constant 0 : index
    %33 = vector.load %arg6[%c0_29, %c0_30, %c0_31] : memref<1x1x32xf32, #tpu.memory_space<vmem>>, vector<1x1x32xf32>
    %34 = vector.shape_cast %33 : vector<1x1x32xf32> to vector<1x32xf32>
    %35 = vector.broadcast %34 : vector<1x32xf32> to vector<16x32xf32>
    %36 = arith.addf %32, %35 : vector<16x32xf32>
    %c0_32 = arith.constant 0 : index
    %c0_33 = arith.constant 0 : index
    %c0_34 = arith.constant 0 : index
    %37 = vector.load %arg7[%c0_32, %c0_33, %c0_34] : memref<1x16x32xf32, #tpu.memory_space<vmem>>, vector<1x16x32xf32>
    %38 = vector.shape_cast %37 : vector<1x16x32xf32> to vector<16x32xf32>
    %39 = vector.shape_cast %36 : vector<16x32xf32> to vector<1x16x32xf32>
    tpu.vector_store %arg7[%c0_32, %c0_33, %c0_34], %39 {strides = array<i32>} : memref<1x16x32xf32, #tpu.memory_space<vmem>>, vector<1x16x32xf32>,
    return
  }
  func.func @transform_0(%arg0: i32) -> (i32, i32) {
    %c0_i32 = arith.constant 0 : i32
    %c0_i32_0 = arith.constant 0 : i32
    %c0_i32_1 = arith.constant 0 : i32
    return %c0_i32, %c0_i32_0 : i32, i32
  }
  func.func @transform_1(%arg0: i32) -> (i32, i32) {
    %c0_i32 = arith.constant 0 : i32
    %c0_i32_0 = arith.constant 0 : i32
    %c0_i32_1 = arith.constant 0 : i32
    return %c0_i32, %c0_i32_0 : i32, i32
  }
  func.func @transform_2(%arg0: i32) -> (i32, i32, i32) {
    %c0_i32 = arith.constant 0 : i32
    %c0_i32_0 = arith.constant 0 : i32
    %c0_i32_1 = arith.constant 0 : i32
    return %arg0, %c0_i32, %c0_i32_0 : i32, i32, i32
  }
  func.func @transform_3(%arg0: i32) -> (i32, i32, i32) {
    %c0_i32 = arith.constant 0 : i32
    %c0_i32_0 = arith.constant 0 : i32
    %c0_i32_1 = arith.constant 0 : i32
    return %arg0, %c0_i32, %c0_i32_0 : i32, i32, i32
  }
  func.func @transform_4(%arg0: i32) -> (i32, i32, i32, i32) {
    %c0_i32 = arith.constant 0 : i32
    %c0_i32_0 = arith.constant 0 : i32
    %c0_i32_1 = arith.constant 0 : i32
    %c0_i32_2 = arith.constant 0 : i32
    return %arg0, %c0_i32, %c0_i32_0, %c0_i32_1 : i32, i32, i32, i32
  }
  func.func @transform_5(%arg0: i32) -> (i32, i32, i32) {
    %c0_i32 = arith.constant 0 : i32
    %c0_i32_0 = arith.constant 0 : i32
    %c0_i32_1 = arith.constant 0 : i32
    return %arg0, %c0_i32, %c0_i32_0 : i32, i32, i32
  }
  func.func @transform_6(%arg0: i32) -> (i32, i32, i32) {
    %c0_i32 = arith.constant 0 : i32
    %c0_i32_0 = arith.constant 0 : i32
    %c0_i32_1 = arith.constant 0 : i32
    return %arg0, %c0_i32, %c0_i32_0 : i32, i32, i32
  }
}

</mosaic_0001>

<bundles_post_ra>
// kernel: tpu_custom_call.1
= control target key start
LH: loop header
LB: loop body
LE: loop exit
PB: predicated region body
PF: predicated region fallthrough
CT: control target
= control target key end

     0   :  { %11 = vsyncpa [#allocation3], 0  ;;  %s1059_s0 = inlined_call_operand.vmem [shape: bf16[16,16], index: 0, kind: input, shape index: {}]   ;;  %s1060_s1 = inlined_call_operand.vmem [shape: bf16[16,4], index: 1, kind: input, shape index: {}]   ;;  %s1061_s2 = inlined_call_operand.vmem [shape: bf16[2,4,128], index: 2, kind: input, shape index: {}]   ;;  %s1062_s3 = inlined_call_operand.vmem [shape: f32[2,1,128], index: 3, kind: input, shape index: {}]   ;;  %s1063_s4 = inlined_call_operand.vmem [shape: bf16[2,4,32,8], index: 4, kind: input, shape index: {}]   ;;  %s1064_s5 = inlined_call_operand.vmem [shape: f32[2,1,32], index: 5, kind: input, shape index: {}]   ;;  %s1065_s6 = inlined_call_operand.hbm [shape: f32[2,16,32], index: 6, kind: output, shape index: {}]  }
   0x1   :  { %13 = vsyncpa [#allocation3 + $0x1], 0  ;;  %s922_s21 = smov 0   ;;  %s924_s22 = smov 0  }
   0x2   :  { %s926_s23 = smov 0   ;;  %s928_s24 = smov 0  }
   0x3 LB: > { %s943_s25 = sadd.s32 4294967295, %s878_s24   ;;  %s669_s26 = sadd.s32 4294967294, %s878_s24   ;;  %s878_s24 = sphi %s928_s24, %s1071_s24   ;;  %s874_s23 = sphi %s926_s23, %s1070_s23   ;;  %s870_s22 = sphi %s924_s22, %s1069_s22   ;;  %s866_s21 = sphi %s922_s21, %s1068_s21  }
   0x4   : > { %s947_s27 = sadd.s32 1, %s878_s24   ;;  %s172_s28 = sadd.s32 1, %s874_s23 }
   0x5   : > { %s169_s29 = ssub.s32 %s878_s24, %s947_s27  ;;  %p182_p0 = scmp.ne.s32.totalorder %s874_s23, %s870_s22 }
   0x6   : > { %p170_p1 = scmp.eq.s32.totalorder %s169_s29, 0  ;;  %p183_p2 = scmp.eq.s32.totalorder %s943_s25, 1 }
   0x7   : > { %p188_p3 = scmp.ne.s32.totalorder %s870_s22, %s866_s21  ;;  %p189_p4 = scmp.eq.s32.totalorder %s669_s26, 1 }
   0x8   : > { %s958_s30 = scalar_select %p170_p1, %s874_s23, %s172_s28  }
   0x9   : > { %p960_p5 = por %p183_p2, %p182_p0  ;;  %p964_p6 = por %p189_p4, %p188_p3 }
   0xa   : > { %p672_p7 = scmp.ge.s32.totalorder %s878_s24, 1  ;;  %p240_p8 = scmp.lt.s32.totalorder %s878_s24, 3 }
   0xc   : > { %p241_p9 = pnand %p672_p7, %p240_p8 }
   0xd   : > { %p280_p10 = scmp.lt.s32.totalorder (!%p241_p9), %s943_s25, 1  ;;  %s880_s10 = smov (!%p241_p9), 32  }
   0xe   : > { %244 = sbr.rel (%p241_p9) target bundleno = 831 (0x33f), region = 44  ;;  %s881_s11 = smov (!%p241_p9), 96  }
   0xf   : > { %s882_s12 = smov (!%p241_p9), 64   ;;  %s884_s18 = smov (!%p241_p9), 16  }
  0x10   : > { %s885_s19 = smov (!%p241_p9), 24   ;;  %s836_s28 = scalar_lea.hbm (!%p241_p9), %s1065_s6, 32 }
  0x13   : > { %v743_v0 = vld [vmem:[%s1060_s1] sm:$0xff]  ;;  %vm311_vm0 = vcmask 130048   ;;  %s982_s13 = scalar_select %p280_p10, %s943_s25, 1  ;;  %vm339_vm1 = vcmask 1041408   ;;  %vm335_vm2 = vcmask 31744   ;;  %vm382_vm3 = vcmask 261120  }
  0x14   : > { %v976_v1 = vld [vmem:[%s1059_s0] sm:$0xff]  ;;  %322 = vmatpush.bf16.msra.mxu0 %v743_v0  ;;  %vm532_vm4 = vcmask 64512   ;;  %vm537_vm5 = vcmask 195584  }
  0x15   : > { %s286_s16 = scalar_lea.vmem %s1062_s3, %s982_s13  ;;  %s674_s17 = sshll.u32 %s982_s13, 1 }
  0x16   : > { %s283_s20 = scalar_lea.vmem %s1061_s2, %s674_s17  ;;  %s741_s26 = sshll.u32 %s982_s13, 6  ;;  %v814_v13 = vld [vmem:[%s286_s16] ss:$0 sm:$0xff] }
  0x17   : > { %685 = vmatmul.msk.bf16.vlgmr.msra.gmra.mxu0 %vm311_vm0, %v976_v1  ;;  %v329_v2 = vld [vmem:[%s283_s20] sm:$0x3]  ;;  %s996_s9 = scalar_lea.vmem %s1063_s4, %s741_s26  ;;  %s294_s16 = scalar_lea.vmem %s1064_s5, %s982_s13 }
  0x18   : > { %v341_v3 = vsel %vm339_vm1, %v329_v2, 0  ;;  %v745_v7 = vld [vmem:[%s996_s9 + $0x8] sm:$0xff]  ;;  %v744_v8 = vld [vmem:[%s996_s9] sm:$0xff]  ;;  %v747_v9 = vld [vmem:[%s996_s9 + $0x18] sm:$0xff]  ;;  %s883_s17 = smov 8   ;;  %s277_s20 = sand.u32 1, %s870_s22  }
  0x19   : > { %350 = vmatpush.bf16.msra.mxu1 %v341_v3  ;;  %392 = vmatpush.bf16.msra.mxu2 %v745_v7  ;;  %v751_v10 = vld [vmem:[%s996_s9 + $0x38] sm:$0xff]  ;;  %v746_v11 = vld [vmem:[%s996_s9 + $0x10] sm:$0xff]  ;;  %v749_v25 = vld [vmem:[%s996_s9 + $0x28] sm:$0xff]  ;;  %s673_s26 = sshll.u32 %s277_s20, 4  ;;  %s562_s13 = scalar_lea.sflag [#allocation3], %s277_s20 }
  0x1a   : > { %428 = vmatpush.bf16.msra.mxu3 %v747_v9  ;;  %v750_v12 = vld [vmem:[%s996_s9 + $0x30] sm:$0xff]  ;;  %464 = vmatpush.bf16.msrb.mxu0 %v749_v25  ;;  %v748_v26 = vld [vmem:[%s996_s9 + $0x20] sm:$0xff]  ;;  %s752_s9 = sshll.u32 %s943_s25, 4 }
  0x1b   : > { %v815_v57 = vld [vmem:[%s294_s16] ss:$0 sm:$0xff]  ;;  %s573_s14 = scalar_lea.hbm %s1065_s6, %s752_s9 }
  0x1d   : > { %393 = vmatpush.bf16.msra.mxu2 %v744_v8  ;;  %500 = vmatpush.bf16.msrb.mxu1 %v751_v10 }
  0x1e   : > { %429 = vmatpush.bf16.msra.mxu3 %v746_v11  ;;  %465 = vmatpush.bf16.msrb.mxu0 %v748_v26 }
  0x21   : > { %501 = vmatpush.bf16.msrb.mxu1 %v750_v12 }
  0x94   : > { %v324_v4 = vpop.f32.mrf.mxu0 }
  0x9c   : > { %v326_v5 = vpop.f32.mrf.mxu0 }
  0x9d   : > { %v330_v6 = vpack.c.bf16 %v326_v5, %v324_v4 }
  0x9f   : > { %686 = vmatmul.msk.bf16.vlgmr.msra.gmra.mxu1 %vm335_vm2, %v330_v6 }
 0x11c   : > { %v352_v14 = vpop.f32.mrf.mxu1 }
 0x11d   : > { %v353_v15 = vadd.f32 %v814_v13, %v352_v14 }
 0x11f   : > { %v357_v16 = vmax.f32 %v353_v15, 0.0 }
 0x121   : > { %v359_v19 = vpack.c.bf16 %v357_v16, %v357_v16 }
 0x123   : > { %v367_v22 = vunpack.c.l.b16 %v359_v19 }
 0x124   : > { %v354_v17 = vpop.f32.mrf.mxu1 }
 0x125   : > { %v355_v18 = vadd.f32 %v814_v13, %v354_v17 }
 0x127   : > { %v358_v20 = vmax.f32 %v355_v18, 0.0 }
 0x129   : > { %v360_v21 = vpack.c.bf16 %v358_v20, %v358_v20 }
 0x12b   : > { %v368_v23 = vunpack.c.l.b16 %v360_v21 }
 0x12d   : > { %v369_v24 = vpack.c.b16 %v368_v23, %v367_v22 }
 0x12f   : > { %477 = vrot.lane.b32.xlu1 %v369_v24, %s880_s10  ;;  %405 = vrot.lane.b32.xlu0 %v369_v24, %s881_s11  ;;  %s279_s10 = scalar_lea.vmem [#allocation2], %s673_s26 }
 0x130   : > { %695 = vmatmul.msk.bf16.vlgmr.msra.gmra.mxu2 %vm382_vm3, %v369_v24  ;;  %s574_s15 = sshll.u32 %s279_s10, 4  ;;  %s575_s15 = int_to_ptr.vmem [resolvable:$true] %s574_s15 }
 0x137   : > { %441 = vrot.lane.b32.xlu0 %v369_v24, %s882_s12 }
 0x1a1   : > { %v478_v27 = vpop.permute.xlu1 %477  ;;  %v406_v28 = vpop.permute.xlu0 %405 }
 0x1a2   : > { %708 = vmatmul.msk.bf16.vlgmr.msra.gmra.mxu3 %vm382_vm3, %v406_v28  ;;  %734 = vmatmul.msk.bf16.vlgmr.msrb.gmra.mxu1 %vm382_vm3, %v478_v27 }
 0x1a9   : > { %v442_v29 = vpop.permute.xlu0 %441 }
 0x1aa   : > { %721 = vmatmul.msk.bf16.vlgmr.msrb.gmra.mxu0 %vm382_vm3, %v442_v29 }
 0x1b3   : > { %v395_v40 = vpop.f32.mrf.mxu2 }
 0x1bb   : > { %v397_v45 = vpop.f32.mrf.mxu2 }
 0x21f   : > { %v503_v32 = vpop.f32.mrf.mxu1 }
 0x225   : > { %v431_v30 = vpop.f32.mrf.mxu3 }
 0x227   : > { %v467_v31 = vpop.f32.mrf.mxu0  ;;  %v505_v37 = vpop.f32.mrf.mxu1 }
 0x228   : > { %v809_v38 = vpack.i.bf16 %v505_v37, %v503_v32 }
 0x22d   : > { %v433_v33 = vpop.f32.mrf.mxu3 }
 0x22e   : > { %v799_v34 = vpack.i.bf16 %v433_v33, %v431_v30 }
 0x22f   : > { %v469_v35 = vpop.f32.mrf.mxu0 }
 0x230   : > { %v804_v36 = vpack.i.bf16 %v469_v35, %v467_v31  ;;  %800 = vrot.lane.b32.xlu1 %v799_v34, %s883_s17 }
 0x232   : > { %805 = vrot.lane.b32.xlu2 %v804_v36, %s884_s18  ;;  %s576_s18 = sshll.u32 %s573_s14, 4  ;;  %s577_s18 = int_to_ptr.hbm [resolvable:$true] %s576_s18 }
 0x233   : > { %s830_s16 = sshra.s32 %s577_s18, 4  ;;  %s831_s16 = int_to_ptr.hbm [resolvable:$true] %s830_s16 }
 0x234   : > { %s832_s25 = scalar_lea.hbm %s831_s16, 16  ;;  %p837_p0 = scmp.lt.s32.totalorder %s831_s16, %s1065_s6 }
 0x235   : > { %p833_p11 = scmp.ne.s32.totalorder %s831_s16, %s832_s25  ;;  %p838_p1 = scmp.lt.s32.totalorder %s836_s28, %s832_s25 }
 0x237   : > { %p834_p12 = pnand %p833_p11, %p960_p5  ;;  %p839_p2 = por %p838_p1, %p837_p0 }
 0x239   : > { %p835_p13 = pneg %p834_p12 }
 0x23a   : > { %810 = vrot.lane.b32.xlu2 %v809_v38, %s885_s19 }
 0x23b   : > { %p840_p3 = pnand %p839_p2, %p835_p13 }
 0x28c   : > { %v806_v39 = vpop.permute.xlu2 %805 }
 0x28d   : > { %v808_v46 = vunpack.i.h.bf16 %v806_v39  ;;  %v807_v47 = vunpack.i.l.bf16 %v806_v39 }
 0x294   : > { %v811_v41 = vpop.permute.xlu2 %810 }
 0x295   : > { %v813_v48 = vunpack.i.h.bf16 %v811_v41  ;;  %v812_v49 = vunpack.i.l.bf16 %v811_v41 }
 0x2a2   : > { %v801_v42 = vpop.permute.xlu1 %800 }
 0x2a3   : > { %v803_v43 = vunpack.i.h.bf16 %v801_v42  ;;  %v802_v44 = vunpack.i.l.bf16 %v801_v42 }
 0x2a5   : > { %v533_v50 = vsel %vm532_vm4, %v395_v40, %v802_v44  ;;  %v534_v51 = vsel %vm532_vm4, %v397_v45, %v803_v43 }
 0x2a6   : > { %v535_v52 = vsel %vm311_vm0, %v533_v50, %v807_v47  ;;  %v536_v53 = vsel %vm311_vm0, %v534_v51, %v808_v46 }
 0x2a7   : > { %v538_v54 = vsel %vm537_vm5, %v535_v52, %v812_v49  ;;  %v539_v55 = vsel %vm537_vm5, %v536_v53, %v813_v48 }
 0x2a8   : > { %v540_v56 = vpack.c.bf16 %v539_v55, %v538_v54 }
 0x2aa   : > { %552 = vmatpush.bf16.msrb.mxu2 %v540_v56 }
 0x2ad   : > { %735 = vmatmul.msk.bf16.vlgmr.msrb.gmra.mxu2 %vm311_vm0, %v976_v1 }
 0x330   : > { %v554_v58 = vpop.f32.mrf.mxu2 }
 0x331   : > { %v555_v59 = vadd.f32 %v815_v57, %v554_v58 }
 0x333   : > { %559 = vst.msk [vmem:[%s279_s10] sm:$0xff] %vm382_vm3, %v555_v59 }
 0x338   : > { %v556_v60 = vpop.f32.mrf.mxu2 }
 0x339   : > { %v557_v61 = vadd.f32 %v815_v57, %v556_v60 }
 0x33b   : > { %560 = vst.msk [vmem:[%s279_s10 + $0x8] sm:$0xff] %vm382_vm3, %v557_v61 }
 0x33c   : > { %843 = shalt.err (!%p840_p3)
}
 0x33d   : > { %s886_s20 = smov 128  }
 0x33e   : > { %753 = dma.vmem_to_hbm [thread:$0]  (%p960_p5), %s575_s15, 256, %s577_s18, %s562_s13, %s886_s20, %s886_s20, %s883_s17  }
 0x33f PF: > { %p759_p4 = scmp.ge.s32.totalorder %s878_s24, 2  ;;  %s591_s10 = sand.u32 1, %s866_s21  }
 0x340   : > { %s592_s11 = scalar_lea.sflag [#allocation3], %s591_s10 }
 0x341   : > { %p756_p7 = pnand %p759_p4, %p964_p6 }
 0x343   : > { %p757_p8 = pneg %p756_p7 }
 0x345   : > { %861 = dma.done.wait (%p757_p8), %s592_s11, 256  }
 0x346   : > { %863 = vsyncadd (%p757_p8), %s592_s11, 4294967040  ;;  %p16_p9 = scmp.ge.s32.totalorder %s947_s27, 4   ;;  %s1068_s21 = smov %s870_s22 }
 0x347   : > { %s1069_s22 = smov %s874_s23  ;;  %s1070_s23 = smov %s958_s30 }
 0x348   : > { %s1071_s24 = smov %s947_s27  ;;  %18 = sbr.rel (!%p16_p9) target bundleno = 3 (0x3), region = 91 }
 0x34d   :  { %598 = vsyncpa [#allocation3], 1 }
 0x34e   :  { %600 = vsyncpa [#allocation3 + $0x1], 1 }

</bundles_post_ra>
